<compile_context>
chip_gen: v7x
topology: tpu7x:2x2x1
jax: 0.10.0
libtpu: 0.0.40
codegen_flags: <defaults>
</compile_context>

<pallas_src>
import functools

import jax
import jax.numpy as jnp
import numpy as np
from jax.experimental import pallas as pl
from jax.experimental.pallas import tpu as pltpu


def _round_up(x, m):
    return ((x + m - 1) // m) * m


def _pick_tile(n, block_rows, bytes_per_row, vmem_budget=24 << 20):
    """Row-block size: multiple of 8 sublanes, VMEM-budgeted, pad-avoiding."""
    tm = max(8, _round_up(min(block_rows, _round_up(n, 8)), 8))
    # Cap so the double-buffered in+out streams fit comfortably in scoped VMEM
    # (v7x has only 64 MiB physical; v5e's scoped default is 16 MiB).
    while tm > 8 and 2 * tm * bytes_per_row > vmem_budget:
        tm = _round_up(tm // 2, 8)
    # Prefer a tile that divides n exactly: no padded tail rows and no trailing
    # out[:n] HBM copy in the wrapper.
    if n % 8 == 0 and n % tm != 0:
        cand = tm
        while cand >= 8 and n % cand != 0:
            cand -= 8
        if cand >= 8 and 2 * cand >= tm:
            tm = cand
    # Keep at least 2 row blocks when there is enough work so the "parallel"
    # grid axis can be sharded across both TensorCores on v7x.
    n_pad = _round_up(n, tm)
    if n_pad // tm < 2 and n_pad >= 16 and (n_pad // 2) % 8 == 0:
        tm = n_pad // 2
    return tm


def _bert_embed_kernel(tok_ref,            # (TM, H) gathered token rows (table dtype)
                       ids_ref,            # (TM, 3) int32: [input_id, pos_id, tt_id]
                       pos_tab_ref,        # (max_seq_len, H) f32, VMEM-resident
                       tt_tab_ref,         # (n_token_types, H) f32, VMEM-resident
                       gamma_ref, beta_ref,  # (1, H) f32 LayerNorm params
                       o_ref,              # (TM, H) output block
                       *, empty_id, eps):
    x = tok_ref[...].astype(jnp.float32)                 # (TM, H)
    tm = x.shape[0]

    ids = ids_ref[:, 0:1]                                # (TM, 1) input ids (mask)
    pos = ids_ref[:, 1:2]                                # (TM, 1) position ids
    tt = ids_ref[:, 2:3]                                 # (TM, 1) token-type ids

    # --- Position gather: one-hot matmul on the MXU -------------------------
    # Exact row copy (one-hot weights are 0/1); HIGHEST precision keeps the
    # f32 table values intact. With bf16 tables this becomes a plain bf16 MXU op.
    L = pos_tab_ref.shape[0]
    onehot = (jax.lax.broadcasted_iota(jnp.int32, (tm, L), 1) == pos)
    pos_rows = jnp.dot(onehot.astype(jnp.float32), pos_tab_ref[...],
                       preferred_element_type=jnp.float32,
                       precision=jax.lax.Precision.HIGHEST)

    # --- Token-type gather: chained select over a tiny resident table -------
    # (L-1 selects + single add; out-of-range ids map to row 0, see notes.)
    T = tt_tab_ref.shape[0]
    tt_rows = tt_tab_ref[0:1, :]
    for r in range(1, T):                                # static unroll, tiny T
        tt_rows = jnp.where(tt == r, tt_tab_ref[r:r + 1, :], tt_rows)

    x = x + pos_rows + tt_rows

    # --- LayerNorm over the hidden dimension (f32 statistics) ---------------
    mean = jnp.mean(x, axis=-1, keepdims=True)
    cen = x - mean
    var = jnp.mean(cen * cen, axis=-1, keepdims=True)
    y = cen * jax.lax.rsqrt(var + eps)
    y = y * gamma_ref[...] + beta_ref[...]

    # Dropout: module evaluated in inference mode -> identity.
    # TODO(synk): training-mode dropout (stateful PRNG + 1/(1-p) scaling) not emitted.

    # embeddings[input_ids == empty_id] = 0.0  (vectorized, broadcast over lanes)
    o_ref[...] = jnp.where(ids == empty_id, 0.0, y).astype(o_ref.dtype)


def bert_embeddings_pallas(input_ids, token_type_ids, position_ids,
                           tok_emb, pos_emb, tt_emb, gamma, beta,
                           *, empty_id, eps, block_rows=1024, out_dtype=None):
    B, S = input_ids.shape
    H = tok_emb.shape[1]
    n = B * S

    # Mirror the PyTorch defaults.
    if position_ids is None:
        position_ids = jnp.broadcast_to(jnp.arange(S, dtype=jnp.int32)[None, :], (B, S))
    if token_type_ids is None:
        token_type_ids = jnp.zeros((B, S), jnp.int32)

    # Output follows the embedding-table dtype (bf16 tables -> bf16 output,
    # halving the output HBM stream). f32 here to match the f32 reference.
    if out_dtype is None:
        out_dtype = tok_emb.dtype

    itemsize_in = jnp.dtype(tok_emb.dtype).itemsize
    itemsize_out = jnp.dtype(out_dtype).itemsize
    bytes_per_row = H * (itemsize_in + itemsize_out) + 3 * 4
    tm = _pick_tile(n, block_rows, bytes_per_row)
    n_pad = _round_up(n, tm)
    pad = n_pad - n

    ids = input_ids.reshape(-1).astype(jnp.int32)
    pos = position_ids.reshape(-1).astype(jnp.int32)
    tt = token_type_ids.reshape(-1).astype(jnp.int32)
    # Pack the three per-token id columns into one int32 block: one small DMA
    # per grid step instead of three.
    ids_all = jnp.stack([ids, pos, tt], axis=1)          # (n, 3)
    if pad:
        ids_all = jnp.pad(ids_all, ((0, pad), (0, 0)))   # padded rows sliced off later

    # Vocab gather in the wrapper (XLA gather) in the TABLE dtype -- no f32
    # round-trip of the dominant stream through HBM.
    # TODO(synk): fuse the vocab gather in-kernel (scalar-prefetched ids +
    # tok_emb in memory_space=pl.ANY + double-buffered make_async_copy) to
    # remove this intermediate slab entirely.
    tok_rows = jnp.take(tok_emb, ids_all[:, 0], axis=0)  # (n_pad, H), table dtype

    # Small position / token-type tables and LN params stay VMEM-resident
    # (constant index_map); cast once here, not per grid step.
    pos_tab = pos_emb.astype(jnp.float32)
    tt_tab = tt_emb.astype(jnp.float32)
    gamma2 = gamma.reshape(1, H).astype(jnp.float32)
    beta2 = beta.reshape(1, H).astype(jnp.float32)

    resident_bytes = (pos_tab.shape[0] + tt_tab.shape[0] + 2) * H * 4
    vmem_needed = 2 * tm * bytes_per_row + 2 * tm * 128 * 4 + 2 * resident_bytes
    vmem_limit = int(min(max(2 * vmem_needed, 32 << 20), 64 << 20))

    grid = (n_pad // tm,)
    out = pl.pallas_call(
        functools.partial(_bert_embed_kernel, empty_id=empty_id, eps=eps),
        grid=grid,
        in_specs=[
            pl.BlockSpec((tm, H), lambda i: (i, 0)),             # token-embedding rows
            pl.BlockSpec((tm, 3), lambda i: (i, 0)),             # packed id columns
            pl.BlockSpec((pos_tab.shape[0], H), lambda i: (0, 0)),  # resident pos table
            pl.BlockSpec((tt_tab.shape[0], H), lambda i: (0, 0)),   # resident tt table
            pl.BlockSpec((1, H), lambda i: (0, 0)),              # gamma
            pl.BlockSpec((1, H), lambda i: (0, 0)),              # beta
        ],
        # NOTE: real BERT hidden sizes (768/1024) are lane-dense multiples of
        # 128; for tiny H (like the 32 used in the test) stores are masked
        # sub-vreg writes, which is acceptable at this scale.
        out_specs=pl.BlockSpec((tm, H), lambda i: (i, 0)),
        out_shape=jax.ShapeDtypeStruct((n_pad, H), out_dtype),
        compiler_params=pltpu.CompilerParams(
            dimension_semantics=("parallel",),
            vmem_limit_bytes=vmem_limit),
    )(tok_rows, ids_all, pos_tab, tt_tab, gamma2, beta2)

    if pad:
        out = out[:n]
    return out.reshape(B, S, H)


def bert_embeddings_ref(input_ids, token_type_ids, position_ids,
                        tok_emb, pos_emb, tt_emb, gamma, beta,
                        *, empty_id, eps):
    """Pure-JAX reference mirroring the PyTorch forward (eval mode)."""
    x = (jnp.take(tok_emb, input_ids, axis=0)
         + jnp.take(pos_emb, position_ids, axis=0)
         + jnp.take(tt_emb, token_type_ids, axis=0)).astype(jnp.float32)
    mean = jnp.mean(x, axis=-1, keepdims=True)
    var = jnp.mean((x - mean) ** 2, axis=-1, keepdims=True)
    y = (x - mean) * jax.lax.rsqrt(var + eps) * gamma + beta
    return jnp.where((input_ids == empty_id)[..., None], 0.0, y)


if __name__ == "__main__":
    # Module hyper-parameters (small, consistent with the forward semantics).
    n_tokens = 50
    hidden_dim = 32
    max_seq_len = 16
    n_token_types = 2
    empty_id = 3
    padding_id = 0
    layer_norm_eps = 1e-12

    batch, seq = 2, 8

    key = jax.random.PRNGKey(0)
    k_tok, k_pos, k_tt, k_ids, k_tti = jax.random.split(key, 5)

    # Deterministic parameter init (nn.Embedding ~ N(0,1); padding row zeroed;
    # LayerNorm gamma=1, beta=0).
    tok_emb = jax.random.normal(k_tok, (n_tokens, hidden_dim), jnp.float32)
    tok_emb = tok_emb.at[padding_id].set(0.0)
    pos_emb = jax.random.normal(k_pos, (max_seq_len, hidden_dim), jnp.float32)
    tt_emb = jax.random.normal(k_tt, (n_token_types, hidden_dim), jnp.float32)
    gamma = jnp.ones((hidden_dim,), jnp.float32)
    beta = jnp.zeros((hidden_dim,), jnp.float32)

    # Inputs. Make sure a few positions hit empty_id to exercise the mask.
    input_ids = jax.random.randint(k_ids, (batch, seq), 0, n_tokens, jnp.int32)
    input_ids = input_ids.at[0, 2].set(empty_id).at[1, 5].set(empty_id)
    token_type_ids = jax.random.randint(k_tti, (batch, seq), 0, n_token_types, jnp.int32)
    position_ids = jnp.broadcast_to(jnp.arange(seq, dtype=jnp.int32)[None, :], (batch, seq))

    out = bert_embeddings_pallas(
        input_ids, token_type_ids, position_ids,
        tok_emb, pos_emb, tt_emb, gamma, beta,
        empty_id=empty_id, eps=layer_norm_eps)
    out = jax.block_until_ready(out)

    ref = bert_embeddings_ref(
        input_ids, token_type_ids, position_ids,
        tok_emb, pos_emb, tt_emb, gamma, beta,
        empty_id=empty_id, eps=layer_norm_eps)

    np.testing.assert_allclose(np.asarray(out), np.asarray(ref), rtol=2e-5, atol=2e-5)
    assert out.shape == (batch, seq, hidden_dim)
    print("KERNEL_OK")
</pallas_src>

<mosaic_0001>
module attributes {stable_mosaic.version = 11 : i64} {
  func.func @_bert_embed_kernel(%arg0: i32, %arg1: memref<8x32xf32, #tpu.memory_space<vmem>>, %arg2: memref<8x3xi32, #tpu.memory_space<vmem>>, %arg3: memref<16x32xf32, #tpu.memory_space<vmem>>, %arg4: memref<2x32xf32, #tpu.memory_space<vmem>>, %arg5: memref<1x32xf32, #tpu.memory_space<vmem>>, %arg6: memref<1x32xf32, #tpu.memory_space<vmem>>, %arg7: memref<8x32xf32, #tpu.memory_space<vmem>>) attributes {dimension_semantics = [#tpu.dimension_semantics<parallel>], iteration_bounds = array<i64: 2>, scalar_prefetch = 0 : i64, scratch_operands = 0 : i64, tpu.core_type = #tpu.core_type<tc>, window_params = [{transform_indices = @transform_0, window_bounds = array<i64: 8, 32>}, {transform_indices = @transform_1, window_bounds = array<i64: 8, 3>}, {pipeline_mode = #tpu.pipeline_mode<synchronous>, transform_indices = @transform_2, window_bounds = array<i64: 16, 32>}, {pipeline_mode = #tpu.pipeline_mode<synchronous>, transform_indices = @transform_3, window_bounds = array<i64: 2, 32>}, {pipeline_mode = #tpu.pipeline_mode<synchronous>, transform_indices = @transform_4, window_bounds = array<i64: 1, 32>}, {pipeline_mode = #tpu.pipeline_mode<synchronous>, transform_indices = @transform_5, window_bounds = array<i64: 1, 32>}, {transform_indices = @transform_6, window_bounds = array<i64: 8, 32>}]} {
    %c0 = arith.constant 0 : index
    %c0_0 = arith.constant 0 : index
    %0 = vector.load %arg1[%c0, %c0_0] : memref<8x32xf32, #tpu.memory_space<vmem>>, vector<8x32xf32>
    %c0_1 = arith.constant 0 : index
    %c0_2 = arith.constant 0 : index
    %1 = vector.load %arg2[%c0_1, %c0_2] : memref<8x3xi32, #tpu.memory_space<vmem>>, vector<8x1xi32>
    %c0_3 = arith.constant 0 : index
    %c1 = arith.constant 1 : index
    %2 = vector.load %arg2[%c0_3, %c1] : memref<8x3xi32, #tpu.memory_space<vmem>>, vector<8x1xi32>
    %c0_4 = arith.constant 0 : index
    %c2 = arith.constant 2 : index
    %3 = vector.load %arg2[%c0_4, %c2] : memref<8x3xi32, #tpu.memory_space<vmem>>, vector<8x1xi32>
    %4 = tpu.iota {dimensions = array<i32: 1>} : vector<8x16xi32>
    %5 = vector.broadcast %2 : vector<8x1xi32> to vector<8x16xi32>
    %6 = arith.cmpi eq, %4, %5 : vector<8x16xi32>
    %7 = arith.extui %6 : vector<8x16xi1> to vector<8x16xi32>
    %8 = arith.sitofp %7 : vector<8x16xi32> to vector<8x16xf32>
    %c0_5 = arith.constant 0 : index
    %c0_6 = arith.constant 0 : index
    %9 = vector.load %arg3[%c0_5, %c0_6] : memref<16x32xf32, #tpu.memory_space<vmem>>, vector<16x32xf32>
    %cst = arith.constant dense<0.000000e+00> : vector<8x32xf32>
    %10 = tpu.matmul %8, %9, %cst {dimension_numbers = #tpu.dot_dimension_numbers<[1], [0], [0], [1], [0, 0, 1, 1], [], []>, precision = #tpu.contract_precision<fp32>} : vector<8x16xf32>, vector<16x32xf32>, vector<8x32xf32> -> vector<8x32xf32>
    %c0_7 = arith.constant 0 : index
    %c0_8 = arith.constant 0 : index
    %11 = vector.load %arg4[%c0_7, %c0_8] : memref<2x32xf32, #tpu.memory_space<vmem>>, vector<1x32xf32>
    %c1_i32 = arith.constant 1 : i32
    %12 = vector.broadcast %c1_i32 : i32 to vector<8x1xi32>
    %13 = arith.cmpi eq, %3, %12 : vector<8x1xi32>
    %c1_9 = arith.constant 1 : index
    %c0_10 = arith.constant 0 : index
    %14 = vector.load %arg4[%c1_9, %c0_10] : memref<2x32xf32, #tpu.memory_space<vmem>>, vector<1x32xf32>
    %15 = vector.shape_cast %13 : vector<8x1xi1> to vector<8x1xi1>
    %16 = vector.broadcast %15 : vector<8x1xi1> to vector<8x32xi1>
    %17 = vector.shape_cast %14 : vector<1x32xf32> to vector<1x32xf32>
    %18 = vector.broadcast %17 : vector<1x32xf32> to vector<8x32xf32>
    %19 = vector.shape_cast %11 : vector<1x32xf32> to vector<1x32xf32>
    %20 = vector.broadcast %19 : vector<1x32xf32> to vector<8x32xf32>
    %21 = arith.select %16, %18, %20 : vector<8x32xi1>, vector<8x32xf32>
    %22 = arith.addf %0, %10 : vector<8x32xf32>
    %23 = arith.addf %22, %21 : vector<8x32xf32>
    %cst_11 = arith.constant dense<0.000000e+00> : vector<8xf32>
    %24 = vector.multi_reduction <add>, %23, %cst_11 [1] : vector<8x32xf32> to vector<8xf32>
    %25 = vector.shape_cast %24 : vector<8xf32> to vector<8x1xf32>
    %cst_12 = arith.constant 3.200000e+01 : f32
    %26 = vector.broadcast %cst_12 : f32 to vector<8x1xf32>
    %27 = arith.divf %25, %26 : vector<8x1xf32>
    %28 = vector.broadcast %27 : vector<8x1xf32> to vector<8x32xf32>
    %29 = arith.subf %23, %28 : vector<8x32xf32>
    %30 = arith.mulf %29, %29 : vector<8x32xf32>
    %cst_13 = arith.constant dense<0.000000e+00> : vector<8xf32>
    %31 = vector.multi_reduction <add>, %30, %cst_13 [1] : vector<8x32xf32> to vector<8xf32>
    %32 = vector.shape_cast %31 : vector<8xf32> to vector<8x1xf32>
    %cst_14 = arith.constant 3.200000e+01 : f32
    %33 = vector.broadcast %cst_14 : f32 to vector<8x1xf32>
    %34 = arith.divf %32, %33 : vector<8x1xf32>
    %cst_15 = arith.constant 9.99999996E-13 : f32
    %35 = vector.broadcast %cst_15 : f32 to vector<8x1xf32>
    %36 = arith.addf %34, %35 : vector<8x1xf32>
    %37 = math.rsqrt %36 : vector<8x1xf32>
    %38 = vector.broadcast %37 : vector<8x1xf32> to vector<8x32xf32>
    %39 = arith.mulf %29, %38 : vector<8x32xf32>
    %c0_16 = arith.constant 0 : index
    %c0_17 = arith.constant 0 : index
    %40 = vector.load %arg5[%c0_16, %c0_17] : memref<1x32xf32, #tpu.memory_space<vmem>>, vector<1x32xf32>
    %41 = vector.broadcast %40 : vector<1x32xf32> to vector<8x32xf32>
    %42 = arith.mulf %39, %41 : vector<8x32xf32>
    %c0_18 = arith.constant 0 : index
    %c0_19 = arith.constant 0 : index
    %43 = vector.load %arg6[%c0_18, %c0_19] : memref<1x32xf32, #tpu.memory_space<vmem>>, vector<1x32xf32>
    %44 = vector.broadcast %43 : vector<1x32xf32> to vector<8x32xf32>
    %45 = arith.addf %42, %44 : vector<8x32xf32>
    %c3_i32 = arith.constant 3 : i32
    %46 = vector.broadcast %c3_i32 : i32 to vector<8x1xi32>
    %47 = arith.cmpi eq, %1, %46 : vector<8x1xi32>
    %cst_20 = arith.constant 0.000000e+00 : f32
    %48 = vector.shape_cast %47 : vector<8x1xi1> to vector<8x1xi1>
    %49 = vector.broadcast %48 : vector<8x1xi1> to vector<8x32xi1>
    %50 = vector.broadcast %cst_20 : f32 to vector<8x32xf32>
    %51 = arith.select %49, %50, %45 : vector<8x32xi1>, vector<8x32xf32>
    %c0_21 = arith.constant 0 : index
    %c0_22 = arith.constant 0 : index
    %52 = vector.load %arg7[%c0_21, %c0_22] : memref<8x32xf32, #tpu.memory_space<vmem>>, vector<8x32xf32>
    tpu.vector_store %arg7[%c0_21, %c0_22], %51 {strides = array<i32>} : memref<8x32xf32, #tpu.memory_space<vmem>>, vector<8x32xf32>,
    return
  }
  func.func @transform_0(%arg0: i32) -> (i32, i32) {
    %c0_i32 = arith.constant 0 : i32
    %c0_i32_0 = arith.constant 0 : i32
    return %arg0, %c0_i32 : i32, i32
  }
  func.func @transform_1(%arg0: i32) -> (i32, i32) {
    %c0_i32 = arith.constant 0 : i32
    %c0_i32_0 = arith.constant 0 : i32
    return %arg0, %c0_i32 : i32, i32
  }
  func.func @transform_2(%arg0: i32) -> (i32, i32) {
    %c0_i32 = arith.constant 0 : i32
    %c0_i32_0 = arith.constant 0 : i32
    %c0_i32_1 = arith.constant 0 : i32
    return %c0_i32, %c0_i32_0 : i32, i32
  }
  func.func @transform_3(%arg0: i32) -> (i32, i32) {
    %c0_i32 = arith.constant 0 : i32
    %c0_i32_0 = arith.constant 0 : i32
    %c0_i32_1 = arith.constant 0 : i32
    return %c0_i32, %c0_i32_0 : i32, i32
  }
  func.func @transform_4(%arg0: i32) -> (i32, i32) {
    %c0_i32 = arith.constant 0 : i32
    %c0_i32_0 = arith.constant 0 : i32
    %c0_i32_1 = arith.constant 0 : i32
    return %c0_i32, %c0_i32_0 : i32, i32
  }
  func.func @transform_5(%arg0: i32) -> (i32, i32) {
    %c0_i32 = arith.constant 0 : i32
    %c0_i32_0 = arith.constant 0 : i32
    %c0_i32_1 = arith.constant 0 : i32
    return %c0_i32, %c0_i32_0 : i32, i32
  }
  func.func @transform_6(%arg0: i32) -> (i32, i32) {
    %c0_i32 = arith.constant 0 : i32
    %c0_i32_0 = arith.constant 0 : i32
    return %arg0, %c0_i32 : i32, i32
  }
}

</mosaic_0001>

<bundles_post_ra>
// kernel: tpu_custom_call.1
= control target key start
LH: loop header
LB: loop body
LE: loop exit
PB: predicated region body
PF: predicated region fallthrough
CT: control target
= control target key end

     0   :  { %11 = vsyncpa [#allocation3], 0  ;;  %s1392_s0 = inlined_call_operand.vmem [shape: f32[16,32], index: 0, kind: input, shape index: {}]   ;;  %s1393_s1 = inlined_call_operand.vmem [shape: s32[16,3], index: 1, kind: input, shape index: {}]   ;;  %s1394_s2 = inlined_call_operand.hbm [shape: f32[16,32], index: 2, kind: input, shape index: {}]   ;;  %s1395_s3 = inlined_call_operand.vmem [shape: f32[2,32], index: 3, kind: input, shape index: {}]   ;;  %s1396_s4 = inlined_call_operand.vmem [shape: f32[1,32], index: 4, kind: input, shape index: {}]   ;;  %s1397_s5 = inlined_call_operand.vmem [shape: f32[1,32], index: 5, kind: input, shape index: {}]   ;;  %s1398_s6 = inlined_call_operand.hbm [shape: f32[16,32], index: 6, kind: output, shape index: {}]  }
   0x1   :  { %12 = vsyncpa [#allocation4], 0 }
   0x2   :  { %14 = vsyncpa [#allocation4 + $0x1], 0  ;;  %s1213_s21 = smov 0   ;;  %s1215_s22 = smov 0  }
   0x3   :  { %s1217_s23 = smov 0   ;;  %s1219_s24 = smov 0  }
   0x4 LB: > { %s1234_s25 = sadd.s32 4294967295, %s1166_s24   ;;  %s909_s26 = sadd.s32 4294967294, %s1166_s24   ;;  %s1166_s24 = sphi %s1219_s24, %s1414_s24   ;;  %s1162_s23 = sphi %s1217_s23, %s1413_s23   ;;  %s1158_s22 = sphi %s1215_s22, %s1412_s22   ;;  %s1154_s21 = sphi %s1213_s21, %s1411_s21  }
   0x5   : > { %s1238_s27 = sadd.s32 1, %s1166_s24   ;;  %s163_s28 = sadd.s32 1, %s1162_s23 }
   0x6   : > { %s160_s29 = ssub.s32 %s1166_s24, %s1238_s27  ;;  %p173_p0 = scmp.ne.s32.totalorder %s1162_s23, %s1158_s22 }
   0x7   : > { %p161_p1 = scmp.eq.s32.totalorder %s160_s29, 0  ;;  %p174_p2 = scmp.eq.s32.totalorder %s1234_s25, 1 }
   0x8   : > { %p179_p3 = scmp.ne.s32.totalorder %s1158_s22, %s1154_s21  ;;  %p180_p4 = scmp.eq.s32.totalorder %s909_s26, 1 }
   0x9   : > { %s1249_s30 = scalar_select %p161_p1, %s1162_s23, %s163_s28  }
   0xa   : > { %p1251_p5 = por %p174_p2, %p173_p0  ;;  %p1255_p6 = por %p180_p4, %p179_p3 }
   0xb   : > { %p910_p7 = scmp.ge.s32.totalorder %s1166_s24, 1  ;;  %p187_p8 = scmp.lt.s32.totalorder %s1166_s24, 3 }
   0xc   : > { %s1402_s7 = scalar_select %p1251_p5, 1, 0 }
   0xd   : > { %s1403_s8 = scalar_select %p1255_p6, 1, 0 }
   0xe   : > { %p1399_p9 = scmp.eq.s32.totalorder %s1234_s25, 0  ;;  %p1262_p10 = pnand %p910_p7, %p187_p8 }
   0xf   : > { %s1168_s10 = smov [#allocation2]   ;;  %s1072_s15 = scalar_lea.hbm %s1394_s2, 256 }
  0x10   : > { %s1404_s9 = scalar_select %p1262_p10, 1, 0 }
  0x11   : > { %s199_s11 = sshll.u32 %s1168_s10, 4  ;;  %p1014_p11 = pneg %p1262_p10  ;;  %s200_s11 = int_to_ptr.vmem [resolvable:$true] %s199_s11 }
  0x12   : > { %p1073_p13 = scmp.ne.s32.totalorder %s1394_s2, %s1072_s15  ;;  %p1079_p3 = scmp.lt.u32.totalorder %s1072_s15, %s1394_s2 }
  0x13   : > { %p1270_p12 = pnand %p1399_p9, %p1014_p11 }
  0x15   : > { %p1074_p0 = pneg %p1270_p12 }
  0x17   : > { %p1075_p1 = pnand %p1074_p0, %p1073_p13 }
  0x19   : > { %p1076_p2 = pneg %p1075_p1 }
  0x1b   : > { %p1081_p4 = pnand %p1079_p3, %p1076_p2 }
  0x1d   : > { %1084 = shalt.err (!%p1081_p4)
}
  0x1e   : > { %s1085_s20 = scalar_lea.vmem %s200_s11, 256  ;;  %p1093_p9 = scmp.lt.s32.totalorder %s200_s11, %s200_s11 }
  0x1f   : > { %p1086_p7 = scmp.ne.s32.totalorder %s200_s11, %s1085_s20  ;;  %p1094_p6 = scmp.lt.s32.totalorder %s1085_s20, %s1085_s20 }
  0x21   : > { %p1088_p8 = pnand %p1086_p7, %p1074_p0  ;;  %p1095_p5 = por %p1094_p6, %p1093_p9 }
  0x23   : > { %p1089_p11 = pneg %p1088_p8 }
  0x25   : > { %p1096_p10 = pnand %p1095_p5, %p1089_p11 }
  0x27   : > { %1099 = shalt.err (!%p1096_p10)
}
  0x28   : > { %s1169_s26 = smov 128   ;;  %s1170_s28 = smov 8  }
  0x29   : > { %1017 = dma.hbm_to_vmem [thread:$0]  (!%p1270_p12), %s1394_s2, 256, %s200_s11, [#allocation3], %s1169_s26, %s1169_s26, %s1170_s28  }
  0x2a   : > { %p1406_p13 = scmp.ne.s32.totalorder %s1404_s9, 0 }
  0x2b   : > { %p1407_p1 = scmp.eq.s32.totalorder (!%p1406_p13), %s1234_s25, 0 }
  0x2c   : > { %238 = sbr.rel (%p1406_p13) target bundleno = 754 (0x2f2), region = 44 }
  0x33   : > { %1145 = dma.done.wait (%p1407_p1), [#allocation3], 256   ;;  %p1408_p0 = pmov %p1407_p1 }
  0x34   : > { %p271_p5 = scmp.lt.s32.totalorder %s1234_s25, 1  ;;  %v1171_v0 = vmov 1   ;;  %v1172_v1 = vmov 0.0|0.0   ;;  %v289_v3 = vld [vmem:[#allocation2] sm:$0xff]  ;;  %v290_v4 = vld [vmem:[#allocation2 + $0x8] sm:$0xff]  ;;  %vm1173_vm0 = vmmov 0   ;;  %v281_v23 = vlaneseq }
  0x35   : > { %1147 = vsyncadd (%p1408_p0), [#allocation3], 4294967040  ;;  %1066 = vset.pattern.permute.xlu0 %v1171_v0  ;;  %993 = vmatprep.subr.bf16.mxu1 %v1172_v1  ;;  %v296_v5 = vand.u32 4294901760, %v289_v3  ;;  %v299_v6 = vand.u32 4294901760, %v290_v4  ;;  %v1174_v7 = vmov 0.0   ;;  %v1175_v20 = vmov 2  }
  0x36   : > { %s1298_s12 = scalar_select %p271_p5, %s1234_s25, 1  ;;  %990 = vmatprep.subr.bf16.mxu0 %v1172_v1  ;;  %959 = vmatprep.mubr.msk.f32.mxu1 %vm1173_vm0, %v1174_v7  ;;  %v1176_v21 = vmov 0   ;;  %v282_v24 = vand.u32 127, %v281_v23  ;;  %vm291_vm2 = vcmask 130048   ;;  %v923_v49 = vld [vmem:[%s1395_s3] ss:$0 sm:$0xff] }
  0x37   : > { %952 = vmatprep.mubr.msk.f32.mxu0 %vm1173_vm0, %v1174_v7  ;;  %v374_v8 = vsub.f32 %v289_v3, %v296_v5  ;;  %v381_v9 = vsub.f32 %v290_v4, %v299_v6  ;;  %v991_v10 = vpack.c.bf16 %v299_v6, %v296_v5  ;;  %1068 = vset.pattern.permute.xlu1 %v1176_v21  ;;  %v922_v50 = vld [vmem:[%s1395_s3 + $0x1] ss:$0 sm:$0xff]  ;;  %vm773_vm5 = vcmask 261120   ;;  %s268_s28 = sand.u32 1, %s1158_s22   ;;  %v924_v4 = vld [vmem:[%s1396_s4] ss:$0 sm:$0xff] }
  0x38   : > { %s916_s9 = sshll.u32 %s1298_s12, 3  ;;  %s915_s29 = sshll.u32 %s268_s28, 3 }
  0x39   : > { %s278_s14 = scalar_lea.vmem %s1393_s1, %s916_s9  ;;  %v375_v11 = vand.u32 4294901760, %v374_v8  ;;  %v382_v12 = vand.u32 4294901760, %v381_v9  ;;  %992 = vmatpush3.bf16.msra.mxu0 %v991_v10  ;;  %v997_v18 = vpack.c.bf16 %v381_v9, %v374_v8  ;;  %s274_s17 = scalar_lea.vmem %s1392_s0, %s916_s9 }
  0x3a   : > { %v1306_v2 = vld [vmem:[%s278_s14] sm:$0xff]  ;;  %996 = vmatprep.subr.bf16.mxu0 %v1172_v1  ;;  %s927_s13 = sshll.u32 %s1234_s25, 7  ;;  %s270_s14 = scalar_lea.vmem [#allocation5], %s915_s29 }
  0x3b   : > { %284 = vperm.xlu0 %1066, %v1306_v2   ;;  %v376_v13 = vsub.f32 %v374_v8, %v375_v11  ;;  %v383_v14 = vsub.f32 %v381_v9, %v382_v12  ;;  %v1003_v19 = vpack.c.bf16 %v382_v12, %v375_v11  ;;  %vm755_vm1 = vcmp.eq.s32.totalorder %v1306_v2, 1  ;;  %v279_v51 = vld [vmem:[%s274_s17] sm:$0xff]  ;;  %s826_s15 = sshll.u32 %s270_s14, 4  ;;  %s1349_s18 = scalar_lea.hbm %s1398_s6, %s927_s13  ;;  %s1351_s15 = int_to_ptr.vmem [resolvable:$true] %s826_s15 }
  0x3c   : > { %v757_v22 = vsel %vm755_vm1, 1, %v1176_v21  ;;  %vm804_vm6 = vcmp.eq.s32.totalorder %v1306_v2, 3  ;;  %v925_v2 = vld [vmem:[%s1397_s5] ss:$0 sm:$0xff]  ;;  %s813_s19 = scalar_lea.sflag [#allocation4], %s268_s28  ;;  %s1100_s20 = scalar_lea.vmem %s1351_s15, 128 }
  0x3d   : > { %v377_v15 = vand.u32 4294901760, %v376_v13  ;;  %v384_v16 = vand.u32 4294901760, %v383_v14  ;;  %v805_v62 = vsel %vm804_vm6, 1, %v1176_v21  ;;  %p1101_p6 = scmp.ne.s32.totalorder %s1351_s15, %s1100_s20  ;;  %p1409_p9 = scmp.ne.s32.totalorder %s1402_s7, 0 }
  0x3e   : > { %s1177_s25 = smov [#allocation5]  }
  0x3f   : > { %v994_v17 = vpack.c.bf16 %v384_v16, %v377_v15  ;;  %1067 = vset.pattern.permute.xlu0 %v1175_v20  ;;  %p1102_p10 = pnand %p1101_p6, %p1409_p9  ;;  %s1104_s26 = sshll.u32 %s1177_s25, 4  ;;  %s1105_s26 = int_to_ptr.vmem [resolvable:$false] %s1104_s26 }
  0x40   : > { %759 = vperm.xlu0 %1067, %v757_v22   ;;  %s1106_s29 = scalar_lea.vmem %s1105_s26, 256  ;;  %p1107_p2 = scmp.lt.s32.totalorder %s1351_s15, %s1105_s26 }
  0x41   : > { %995 = vmatpush3.bf16.msra.mxu1 %v994_v17  ;;  %p1103_p12 = pneg %p1102_p10  ;;  %p1108_p3 = scmp.lt.s32.totalorder %s1106_s29, %s1100_s20 }
  0x42   : > { %999 = vmatprep.subr.bf16.mxu1 %v1172_v1 }
  0x43   : > { %p1109_p4 = por %p1108_p3, %p1107_p2 }
  0x44   : > { %1069 = vset.pattern.permute.xlu0 %v1176_v21 }
  0x45   : > { %p1110_p7 = pnand %p1109_p4, %p1103_p12 }
  0xba   : > { %v285_v25 = vpop.permute.xlu0 %284 }
  0xbb   : > { %vm286_vm3 = vcmp.eq.s32.totalorder %v282_v24, %v285_v25 }
  0xbc   : > { %v918_v26 = vsel %vm286_vm3, 1.0, %v1174_v7 }
  0xbd   : > { %v293_v27 = vsel %vm291_vm2, %v918_v26, 0  ;;  %960 = vmatmul.mubr.msk.f32.vlgmr.msra.gmra.mrb[0].mxu1 %vm291_vm2, %v918_v26 }
  0xbe   : > { %v363_v28 = vsub.f32 %v293_v27, %v293_v27  ;;  %1001 = vmatpush3.bf16.msra.mxu1 %v991_v10  ;;  %973 = vmatprep.mubr.msk.f32.mxu1 %vm1173_vm0, %v1174_v7 }
  0xbf   : > { %1005 = vmatprep.subr.bf16.mxu1 %v1172_v1  ;;  %v760_v44 = vpop.permute.xlu0 %759 }
  0xc0   : > { %v364_v29 = vand.u32 4294901760, %v363_v28  ;;  %vm761_vm4 = vcmp.eq.s32.totalorder %v760_v44, 1 }
  0xc1   : > { %v770_v53 = vsel %vm761_vm4, %v922_v50, %v923_v49 }
  0xc2   : > { %974 = vmatmul.mubr.f32.vlgmr.msra.gmra.mrb[2].mxu1 %v364_v29  ;;  %v365_v30 = vsub.f32 %v363_v28, %v364_v29 }
  0xc3   : > { %1007 = vmatpush3.bf16.msra.mxu1 %v991_v10  ;;  %987 = vmatprep.mubr.msk.f32.mxu1 %vm1173_vm0, %v1174_v7 }
  0xc4   : > { %v366_v31 = vand.u32 4294901760, %v365_v30 }
  0xc6   : > { %953 = vmatmul.mubr.f32.vlgmr.msra.gmra.mrb[0].mxu0 %v366_v31  ;;  %988 = vmatmul.mubr.msk.f32.vlgmr.msra.gmra.mrb[4].mxu1 %vm291_vm2, %v918_v26 }
  0xc7   : > { %998 = vmatpush3.bf16.msra.mxu0 %v997_v18  ;;  %966 = vmatprep.mubr.msk.f32.mxu0 %vm1173_vm0, %v1174_v7 }
  0xc8   : > { %1002 = vmatprep.subr.bf16.mxu0 %v1172_v1 }
  0xca   : > { %967 = vmatmul.mubr.f32.vlgmr.msra.gmra.mrb[2].mxu0 %v363_v28 }
  0xcb   : > { %1004 = vmatpush3.bf16.msra.mxu0 %v1003_v19  ;;  %980 = vmatprep.mubr.msk.f32.mxu0 %vm1173_vm0, %v1174_v7 }
  0xce   : > { %981 = vmatmul.mubr.msk.f32.vlgmr.msra.gmra.mrb[4].mxu0 %vm291_vm2, %v918_v26 }
 0x190   : > { %v449_v32 = vpop.f32.mrb[0].mxu1 }
 0x191   : > { %v961_v33 = vpop.f32.mrb[1].mxu1 }
 0x195   : > { %v600_v34 = vpop.f32.mrb[2].mxu1 }
 0x196   : > { %v975_v35 = vpop.f32.mrb[3].mxu1 }
 0x199   : > { %v368_v36 = vpop.f32.mrb[0].mxu0  ;;  %v750_v37 = vpop.f32.mrb[4].mxu1 }
 0x19a   : > { %v450_v38 = vadd.f32 %v449_v32, %v368_v36  ;;  %v954_v39 = vpop.f32.mrb[1].mxu0  ;;  %v989_v40 = vpop.f32.mrb[5].mxu1 }
 0x19d   : > { %v525_v41 = vpop.f32.mrb[2].mxu0 }
 0x19e   : > { %v526_v42 = vadd.f32 %v525_v41, %v450_v38  ;;  %v968_v43 = vpop.f32.mrb[3].mxu0 }
 0x1a0   : > { %v601_v45 = vadd.f32 %v600_v34, %v526_v42 }
 0x1a1   : > { %v677_v46 = vpop.f32.mrb[4].mxu0 }
 0x1a2   : > { %v678_v47 = vadd.f32 %v677_v46, %v601_v45  ;;  %v982_v48 = vpop.f32.mrb[5].mxu0 }
 0x1a4   : > { %v751_v52 = vadd.f32 %v750_v37, %v678_v47 }
 0x1a6   : > { %v771_v54 = vadd.f32 %v751_v52, %v279_v51 }
 0x1a8   : > { %v772_v55 = vadd.f32 %v771_v54, %v770_v53 }
 0x1aa   : > { %v774_v56 = vsel %vm773_vm5, %v772_v55, 0.0 }
 0x1ab   : > { %775 = vadd.xlane.f32.xlu1 %v774_v56 }
 0x238   : > { %v776_v57 = vpop.xlane.xlu1 %775 }
 0x239   : > { %v778_v58 = vmul.f32 0.03125, %v776_v57 }
 0x23b   : > { %v779_v59 = vsub.f32 %v772_v55, %v778_v58 }
 0x23d   : > { %v780_v60 = vmul.f32 %v779_v59, %v779_v59 }
 0x23f   : > { %v781_v61 = vsel %vm773_vm5, %v780_v60, 0.0 }
 0x240   : > { %782 = vadd.xlane.f32.xlu1 %v781_v61 }
 0x251   : > { %807 = vperm.xlu1 %1068, %v805_v62  }
 0x2cd   : > { %v783_v63 = vpop.xlane.xlu1 %782 }
 0x2ce   : > { %v784_v0 = vmul.f32 0.03125, %v783_v63 }
 0x2d0   : > { %v785_v1 = vadd.f32 1e-12, %v784_v0 }
 0x2d1   : > { %v808_v6 = vpop.permute.xlu1 %807 }
 0x2d2   : > { %1070 = vrsqrt.f32 %v785_v1  ;;  %vm809_vm7 = vcmp.eq.s32.totalorder %v808_v6, 1 }
 0x2dc   : > { %v1071_v3 = vpop.eup %1070 }
 0x2dd   : > { %v787_v5 = vmul.f32 %v1071_v3, %v779_v59 }
 0x2df   : > { %v795_v7 = vmul.f32 %v924_v4, %v787_v5 }
 0x2e1   : > { %v803_v8 = vadd.f32 %v925_v2, %v795_v7 }
 0x2e3   : > { %v810_v9 = vsel %vm809_vm7, 0.0, %v803_v8 }
 0x2e4   : > { %811 = vst.msk [vmem:[%s270_s14] sm:$0xff] %vm773_vm5, %v810_v9 }
 0x2e5   : > { %1113 = shalt.err (!%p1110_p7)
}
 0x2e6   : > { %s1114_s28 = scalar_lea.hbm %s1349_s18, 128  ;;  %s1118_s9 = scalar_lea.hbm %s1398_s6, 256 }
 0x2e7   : > { %p1115_p8 = scmp.ne.s32.totalorder %s1349_s18, %s1114_s28  ;;  %p1119_p1 = scmp.lt.u32.totalorder %s1349_s18, %s1398_s6 }
 0x2e8   : > { %p1120_p0 = scmp.lt.u32.totalorder %s1118_s9, %s1114_s28  ;;  %p1122_p6 = scmp.lt.u32.totalorder %s1114_s28, %s1349_s18 }
 0x2e9   : > { %p1116_p11 = pnand %p1115_p8, %p1409_p9 }
 0x2ea   : > { %p1121_p5 = por %p1120_p0, %p1119_p1 }
 0x2eb   : > { %p1117_p13 = pneg %p1116_p11 }
 0x2ec   : > { %p1123_p10 = por %p1122_p6, %p1121_p5 }
 0x2ee   : > { %p1124_p12 = pnand %p1123_p10, %p1117_p13 }
 0x2f0   : > { %1127 = shalt.err (!%p1124_p12)
}
 0x2f1   : > { %1012 = dma.vmem_to_hbm [thread:$0]  (%p1409_p9), %s1351_s15, 128, %s1349_s18, %s813_s19  }
 0x2f2 PF: > { %p1024_p2 = scmp.ge.s32.totalorder %s1166_s24, 2  ;;  %s838_s14 = sand.u32 1, %s1154_s21  }
 0x2f3   : > { %p1410_p3 = scmp.ne.s32.totalorder %s1403_s8, 0  ;;  %s839_s16 = scalar_lea.sflag [#allocation4], %s838_s14 }
 0x2f5   : > { %p1019_p4 = pnand %p1024_p2, %p1410_p3 }
 0x2f7   : > { %1149 = dma.done.wait (!%p1019_p4), %s839_s16, 128  }
 0x2f8   : > { %1151 = vsyncadd (!%p1019_p4), %s839_s16, 4294967168  ;;  %p17_p7 = scmp.ge.s32.totalorder %s1238_s27, 4   ;;  %s1411_s21 = smov %s1158_s22 }
 0x2f9   : > { %s1412_s22 = smov %s1162_s23  ;;  %s1413_s23 = smov %s1249_s30 }
 0x2fa   : > { %s1414_s24 = smov %s1238_s27  ;;  %19 = sbr.rel (!%p17_p7) target bundleno = 4 (0x4), region = 87 }
 0x301   :  { %844 = vsyncpa [#allocation3], 1 }
 0x302   :  { %846 = vsyncpa [#allocation3 + $0x1], 1 }
 0x303   :  { %847 = vsyncpa [#allocation4], 1 }
 0x304   :  { %849 = vsyncpa [#allocation4 + $0x1], 1 }

</bundles_post_ra>
